<compile_context>
chip_gen: v7x
topology: tpu7x:2x2x1
jax: 0.10.0
libtpu: 0.0.40
codegen_flags: <defaults>
</compile_context>

<pallas_src>
import functools

import jax
import jax.numpy as jnp
import numpy as np
from jax import lax
from jax.experimental import pallas as pl
from jax.experimental.pallas import tpu as pltpu


def _round_up(x, m):
    return ((x + m - 1) // m) * m


def _num_tensorcores():
    # Only v7x has 2 TensorCores per chip; batch sharding across cores only pays there.
    try:
        kind = jax.devices()[0].device_kind.lower()
    except Exception:
        return 1
    return 2 if "v7" in kind else 1


# ----------------------------- Pallas kernel -----------------------------
def rnn_recurrence_kernel(nch_ref, lens_ref, z_ref, whh_ref, h0_ref, out_ref,
                          *, t_chunk, unrolled):
    """One (batch-block, time-chunk) grid step of the tanh-RNN recurrence.

    nch_ref:  (n_bblk,)     int32 SMEM  valid time-chunk count per batch block (prefetch)
    lens_ref: (Bt, 1)       int32       valid lengths (padded rows hold 0)
    z_ref:    (Tc, Bt, Hp)  f32         precomputed x @ W_ih + b_ih + b_hh for this chunk
    whh_ref:  (Hp, Hp)      bf16        == PyTorch weight_hh_l0.T, VMEM-resident
    h0_ref:   (Bt, Hp)      f32         initial hidden state, VMEM-resident
    out_ref:  (Bt, Hp)      f32         hidden carry / final output (resident across time)
    """
    nb = pl.program_id(0)                     # batch-block index ("parallel")
    c = pl.program_id(1)                      # time-chunk index ("arbitrary")

    @pl.when(c == 0)
    def _init():
        out_ref[...] = h0_ref[...]

    # Skip chunks past this batch block's longest sequence: no compute, and the Z
    # index_map clamps to an already-resident block, so no new DMA either.
    @pl.when(c < nch_ref[nb])
    def _compute():
        h = out_ref[...]
        w = whh_ref[...]                          # bf16, loop-invariant
        rel = lens_ref[...] - c * t_chunk         # (Bt,1) remaining valid steps (hoisted)

        # TODO(synk): hold W_hh in the MXU staging registers across the chunk via
        # pltpu.matmul_push_rhs / matmul_acc_lhs / matmul_pop so the (Hp,Hp) weight is
        # not re-streamed through the MXU on every serial step.
        def step(i, h):
            h_new = jnp.tanh(z_ref[i] + jnp.dot(h.astype(jnp.bfloat16), w,
                                                preferred_element_type=jnp.float32))
            return jnp.where(i < rel, h_new, h)   # pack_padded masking

        if unrolled:                              # short chunk: fully static unroll
            for i in range(t_chunk):
                h = step(i, h)
        else:                                     # long chunk: bound live ranges
            h = lax.fori_loop(0, t_chunk, step, h, unroll=8)
        out_ref[...] = h


# ------------------------------ JAX wrapper ------------------------------
@jax.jit
def program_encoder_forward(tokens, seq_lengths, params):
    """tokens: (B, T) int32, seq_lengths: (B,) int32 -> (B, H) float32."""
    emb_table = params["embedding"]                 # (V, E)
    w_ih = params["w_ih"]                           # (E, H)  == weight_ih_l0.T
    w_hh = params["w_hh"]                           # (H, H)  == weight_hh_l0.T
    bias = (params["b_ih"] + params["b_hh"]).astype(jnp.float32)   # (1, H)
    h0 = params["h0"].astype(jnp.float32)           # (B, H)

    B, T = tokens.shape
    E, H = w_ih.shape
    Hp = _round_up(H, 128)                          # lane-dense hidden width

    # --- batch tiling: pad to sublane (8); split across TCs only on v7x --------
    Bp = _round_up(B, 8)
    if _num_tensorcores() >= 2 and Bp >= 128:
        b_tile = min(_round_up((Bp + 1) // 2, 8), 512)
    else:
        b_tile = min(Bp, 512)                       # single block on v5e/v6e
    Bp = _round_up(Bp, b_tile)
    n_bblk = Bp // b_tile

    # --- time chunking under a VMEM budget (amortize per-grid-step overhead) ---
    vmem_budget = 16 * 1024 * 1024
    fixed = 2 * (Hp * Hp * 2) + 4 * (b_tile * Hp * 4) + 2 * (b_tile * 4)
    per_step = 2 * (b_tile * Hp * 4)                # double-buffered f32 Z per time step
    t_chunk = int(np.clip((vmem_budget - fixed) // per_step, 1, 32))
    t_chunk = min(t_chunk, T)
    Tp = _round_up(T, t_chunk)
    n_chunks = Tp // t_chunk

    # --- pad the cheap inputs (not Z) ------------------------------------------
    lens = jnp.minimum(seq_lengths.astype(jnp.int32), T)     # clamp for robustness
    lens_p = jnp.pad(lens, (0, Bp - B))
    tokens_p = jnp.pad(tokens, ((0, Bp - B), (0, Tp - T)))
    h0_p = jnp.pad(h0, ((0, Bp - B), (0, Hp - H)))
    w_ih_p = jnp.pad(w_ih.astype(jnp.float32), ((0, 0), (0, Hp - H)))
    bias_p = jnp.pad(bias, ((0, 0), (0, Hp - H)))
    w_hh_p = jnp.pad(w_hh.astype(jnp.float32),
                     ((0, Hp - H), (0, Hp - H))).astype(jnp.bfloat16)

    # --- hoisted input projection: one (Bp*Tp, E) x (E, Hp) GEMM emitted -------
    # --- directly in (T, B, H) layout (no separate transpose / pad pass) -------
    x = jnp.take(emb_table, tokens_p, axis=0).astype(jnp.float32)     # (Bp, Tp, E)
    z = jnp.einsum("bte,eh->tbh", x, w_ih_p,
                   preferred_element_type=jnp.float32) + bias_p       # (Tp, Bp, Hp)

    # --- per-batch-block chunk counts (scalar prefetch, dead-chunk skip) -------
    nch = ((lens_p.reshape(n_bblk, b_tile).max(axis=1) + t_chunk - 1)
           // t_chunk).astype(jnp.int32)                               # (n_bblk,)
    lens_2d = lens_p.reshape(Bp, 1)

    kernel = functools.partial(rnn_recurrence_kernel, t_chunk=t_chunk,
                               unrolled=(t_chunk <= 8))
    cost = pl.CostEstimate(
        flops=2 * Tp * Bp * Hp * Hp,
        transcendentals=Tp * Bp * Hp,
        bytes_accessed=4 * Tp * Bp * Hp + 2 * Hp * Hp + 4 * 3 * Bp * Hp + 4 * Bp,
    )

    out = pl.pallas_call(
        kernel,
        out_shape=jax.ShapeDtypeStruct((Bp, Hp), jnp.float32),
        grid_spec=pltpu.PrefetchScalarGridSpec(
            num_scalar_prefetch=1,
            grid=(n_bblk, n_chunks),              # (parallel batch, serial time)
            in_specs=[
                pl.BlockSpec((b_tile, 1), lambda b, c, nch: (b, 0)),              # lens
                pl.BlockSpec((t_chunk, b_tile, Hp),                               # Z chunk
                             lambda b, c, nch: (jnp.maximum(
                                 jnp.minimum(c, nch[b] - 1), 0), b, 0)),
                pl.BlockSpec((Hp, Hp), lambda b, c, nch: (0, 0)),                 # W_hh
                pl.BlockSpec((b_tile, Hp), lambda b, c, nch: (b, 0)),             # h0
            ],
            out_specs=pl.BlockSpec((b_tile, Hp), lambda b, c, nch: (b, 0)),       # carry
        ),
        compiler_params=pltpu.CompilerParams(
            dimension_semantics=("parallel", "arbitrary"),
            vmem_limit_bytes=32 * 1024 * 1024),
        cost_estimate=cost,
    )(nch, lens_2d, z, w_hh_p, h0_p)

    return out[:B, :H]


# --------------------------- reference (pure JAX, f32) ---------------------------
def program_encoder_reference(tokens, seq_lengths, params):
    x = jnp.take(params["embedding"], tokens, axis=0).astype(jnp.float32)  # (B,T,E)
    B, T, _ = x.shape
    h = params["h0"]
    for t in range(T):
        z = x[:, t, :] @ params["w_ih"] + h @ params["w_hh"]
        z = z + params["b_ih"] + params["b_hh"]
        h_new = jnp.tanh(z)
        valid = (t < seq_lengths)[:, None]
        h = jnp.where(valid, h_new, h)
    return h


# ------------------------------ parameter init ------------------------------
def init_params(key, vocab_size, embedding_size, hidden_size, batch_size):
    k_emb, k_wih, k_whh, k_bih, k_bhh, k_h0 = jax.random.split(key, 6)
    bound = 1.0 / np.sqrt(hidden_size)          # PyTorch nn.RNN default init
    # h0 in the PyTorch module is a fresh xavier_normal_ draw per forward; here it
    # is a fixed parameter drawn once with the same fan-based std (gain=1).
    h0_std = np.sqrt(2.0 / (batch_size * hidden_size + hidden_size))
    return {
        "embedding": jax.random.normal(k_emb, (vocab_size, embedding_size),
                                       jnp.float32),
        "w_ih": jax.random.uniform(k_wih, (embedding_size, hidden_size),
                                   jnp.float32, -bound, bound),
        "w_hh": jax.random.uniform(k_whh, (hidden_size, hidden_size),
                                   jnp.float32, -bound, bound),
        "b_ih": jax.random.uniform(k_bih, (1, hidden_size),
                                   jnp.float32, -bound, bound),
        "b_hh": jax.random.uniform(k_bhh, (1, hidden_size),
                                   jnp.float32, -bound, bound),
        "h0": h0_std * jax.random.normal(k_h0, (batch_size, hidden_size),
                                         jnp.float32),
    }


# ---------------------------------- main ----------------------------------
if __name__ == "__main__":
    VOCAB = 50
    BATCH = 2
    SEQ = 8
    EMBED = 32     # small stand-in for embedding_size=300
    HIDDEN = 32    # small stand-in for hidden_size=256

    key = jax.random.PRNGKey(0)
    k_params, k_tok = jax.random.split(key)
    params = init_params(k_params, VOCAB, EMBED, HIDDEN, BATCH)

    tokens = jax.random.randint(k_tok, (BATCH, SEQ), 0, VOCAB, dtype=jnp.int32)
    seq_lengths = jnp.array([SEQ, 5], dtype=jnp.int32)   # ragged (padded) lengths

    out = program_encoder_forward(tokens, seq_lengths, params)
    out = jax.block_until_ready(out)

    ref = program_encoder_reference(tokens, seq_lengths, params)
    # Tolerance relaxed vs the all-f32 version: the recurrent matmul runs in bf16 on
    # the MXU (f32 accumulation), per the performance review.
    np.testing.assert_allclose(np.asarray(out), np.asarray(ref),
                               rtol=2e-2, atol=2e-2)

    assert out.shape == (BATCH, HIDDEN)
    print("KERNEL_OK")
</pallas_src>

<mosaic_0001>
module attributes {stable_mosaic.version = 11 : i64} {
  func.func @rnn_recurrence_kernel(%arg0: i32, %arg1: i32, %arg2: memref<1xi32, #tpu.memory_space<smem>>, %arg3: memref<8x1xi32, #tpu.memory_space<vmem>>, %arg4: memref<8x8x128xf32, #tpu.memory_space<vmem>>, %arg5: memref<128x128xbf16, #tpu.memory_space<vmem>>, %arg6: memref<8x128xf32, #tpu.memory_space<vmem>>, %arg7: memref<8x128xf32, #tpu.memory_space<vmem>>) attributes {dimension_semantics = [#tpu.dimension_semantics<parallel>, #tpu.dimension_semantics<arbitrary>], iteration_bounds = array<i64: 1, 1>, scalar_prefetch = 1 : i64, scratch_operands = 0 : i64, tpu.core_type = #tpu.core_type<tc>, window_params = [{transform_indices = @transform_0, window_bounds = array<i64: 8, 1>}, {transform_indices = @transform_1, window_bounds = array<i64: 8, 8, 128>}, {pipeline_mode = #tpu.pipeline_mode<synchronous>, transform_indices = @transform_2, window_bounds = array<i64: 128, 128>}, {transform_indices = @transform_3, window_bounds = array<i64: 8, 128>}, {transform_indices = @transform_4, window_bounds = array<i64: 8, 128>}]} {
    %c0_i32 = arith.constant 0 : i32
    %0 = arith.cmpi eq, %arg1, %c0_i32 : i32
    %1 = arith.extui %0 : i1 to i32
    %c0_i32_0 = arith.constant 0 : i32
    %2 = arith.cmpi ne, %1, %c0_i32_0 : i32
    scf.if %2 {
      %c0 = arith.constant 0 : index
      %c0_2 = arith.constant 0 : index
      %8 = vector.load %arg6[%c0, %c0_2] : memref<8x128xf32, #tpu.memory_space<vmem>>, vector<8x128xf32>
      %c0_3 = arith.constant 0 : index
      %c0_4 = arith.constant 0 : index
      %9 = vector.load %arg7[%c0_3, %c0_4] : memref<8x128xf32, #tpu.memory_space<vmem>>, vector<8x128xf32>
      tpu.vector_store %arg7[%c0_3, %c0_4], %8 {strides = array<i32>} : memref<8x128xf32, #tpu.memory_space<vmem>>, vector<8x128xf32>,
    } else {
    }
    %3 = arith.index_cast %arg0 : i32 to index
    %4 = memref.load %arg2[%3] : memref<1xi32, #tpu.memory_space<smem>>
    %5 = arith.cmpi slt, %arg1, %4 : i32
    %6 = arith.extui %5 : i1 to i32
    %c0_i32_1 = arith.constant 0 : i32
    %7 = arith.cmpi ne, %6, %c0_i32_1 : i32
    scf.if %7 {
      %c0 = arith.constant 0 : index
      %c0_2 = arith.constant 0 : index
      %8 = vector.load %arg7[%c0, %c0_2] : memref<8x128xf32, #tpu.memory_space<vmem>>, vector<8x128xf32>
      %c0_3 = arith.constant 0 : index
      %c0_4 = arith.constant 0 : index
      %9 = vector.load %arg5[%c0_3, %c0_4] : memref<128x128xbf16, #tpu.memory_space<vmem>>, vector<128x128xbf16>
      %c0_5 = arith.constant 0 : index
      %c0_6 = arith.constant 0 : index
      %10 = vector.load %arg3[%c0_5, %c0_6] : memref<8x1xi32, #tpu.memory_space<vmem>>, vector<8x1xi32>
      %c8_i32 = arith.constant 8 : i32
      %11 = arith.muli %arg1, %c8_i32 : i32
      %12 = vector.broadcast %11 : i32 to vector<8x1xi32>
      %13 = arith.subi %10, %12 : vector<8x1xi32>
      %c0_7 = arith.constant 0 : index
      %c0_8 = arith.constant 0 : index
      %c0_9 = arith.constant 0 : index
      %14 = vector.load %arg4[%c0_7, %c0_8, %c0_9] : memref<8x8x128xf32, #tpu.memory_space<vmem>>, vector<1x8x128xf32>
      %15 = vector.shape_cast %14 : vector<1x8x128xf32> to vector<8x128xf32>
      %16 = arith.truncf %8 : vector<8x128xf32> to vector<8x128xbf16>
      %cst = arith.constant dense<0.000000e+00> : vector<8x128xf32>
      %17 = tpu.matmul %16, %9, %cst {dimension_numbers = #tpu.dot_dimension_numbers<[1], [0], [0], [1], [0, 0, 1, 1], [], []>} : vector<8x128xbf16>, vector<128x128xbf16>, vector<8x128xf32> -> vector<8x128xf32>
      %18 = arith.addf %15, %17 : vector<8x128xf32>
      %19 = math.tanh %18 : vector<8x128xf32>
      %c0_i32_10 = arith.constant 0 : i32
      %20 = vector.broadcast %c0_i32_10 : i32 to vector<8x1xi32>
      %21 = arith.cmpi sgt, %13, %20 : vector<8x1xi32>
      %22 = vector.shape_cast %21 : vector<8x1xi1> to vector<8x1xi1>
      %23 = vector.broadcast %22 : vector<8x1xi1> to vector<8x128xi1>
      %24 = arith.select %23, %19, %8 : vector<8x128xi1>, vector<8x128xf32>
      %c1 = arith.constant 1 : index
      %c0_11 = arith.constant 0 : index
      %c0_12 = arith.constant 0 : index
      %25 = vector.load %arg4[%c1, %c0_11, %c0_12] : memref<8x8x128xf32, #tpu.memory_space<vmem>>, vector<1x8x128xf32>
      %26 = vector.shape_cast %25 : vector<1x8x128xf32> to vector<8x128xf32>
      %27 = arith.truncf %24 : vector<8x128xf32> to vector<8x128xbf16>
      %cst_13 = arith.constant dense<0.000000e+00> : vector<8x128xf32>
      %28 = tpu.matmul %27, %9, %cst_13 {dimension_numbers = #tpu.dot_dimension_numbers<[1], [0], [0], [1], [0, 0, 1, 1], [], []>} : vector<8x128xbf16>, vector<128x128xbf16>, vector<8x128xf32> -> vector<8x128xf32>
      %29 = arith.addf %26, %28 : vector<8x128xf32>
      %30 = math.tanh %29 : vector<8x128xf32>
      %c1_i32 = arith.constant 1 : i32
      %31 = vector.broadcast %c1_i32 : i32 to vector<8x1xi32>
      %32 = arith.cmpi sgt, %13, %31 : vector<8x1xi32>
      %33 = vector.shape_cast %32 : vector<8x1xi1> to vector<8x1xi1>
      %34 = vector.broadcast %33 : vector<8x1xi1> to vector<8x128xi1>
      %35 = arith.select %34, %30, %24 : vector<8x128xi1>, vector<8x128xf32>
      %c2 = arith.constant 2 : index
      %c0_14 = arith.constant 0 : index
      %c0_15 = arith.constant 0 : index
      %36 = vector.load %arg4[%c2, %c0_14, %c0_15] : memref<8x8x128xf32, #tpu.memory_space<vmem>>, vector<1x8x128xf32>
      %37 = vector.shape_cast %36 : vector<1x8x128xf32> to vector<8x128xf32>
      %38 = arith.truncf %35 : vector<8x128xf32> to vector<8x128xbf16>
      %cst_16 = arith.constant dense<0.000000e+00> : vector<8x128xf32>
      %39 = tpu.matmul %38, %9, %cst_16 {dimension_numbers = #tpu.dot_dimension_numbers<[1], [0], [0], [1], [0, 0, 1, 1], [], []>} : vector<8x128xbf16>, vector<128x128xbf16>, vector<8x128xf32> -> vector<8x128xf32>
      %40 = arith.addf %37, %39 : vector<8x128xf32>
      %41 = math.tanh %40 : vector<8x128xf32>
      %c2_i32 = arith.constant 2 : i32
      %42 = vector.broadcast %c2_i32 : i32 to vector<8x1xi32>
      %43 = arith.cmpi sgt, %13, %42 : vector<8x1xi32>
      %44 = vector.shape_cast %43 : vector<8x1xi1> to vector<8x1xi1>
      %45 = vector.broadcast %44 : vector<8x1xi1> to vector<8x128xi1>
      %46 = arith.select %45, %41, %35 : vector<8x128xi1>, vector<8x128xf32>
      %c3 = arith.constant 3 : index
      %c0_17 = arith.constant 0 : index
      %c0_18 = arith.constant 0 : index
      %47 = vector.load %arg4[%c3, %c0_17, %c0_18] : memref<8x8x128xf32, #tpu.memory_space<vmem>>, vector<1x8x128xf32>
      %48 = vector.shape_cast %47 : vector<1x8x128xf32> to vector<8x128xf32>
      %49 = arith.truncf %46 : vector<8x128xf32> to vector<8x128xbf16>
      %cst_19 = arith.constant dense<0.000000e+00> : vector<8x128xf32>
      %50 = tpu.matmul %49, %9, %cst_19 {dimension_numbers = #tpu.dot_dimension_numbers<[1], [0], [0], [1], [0, 0, 1, 1], [], []>} : vector<8x128xbf16>, vector<128x128xbf16>, vector<8x128xf32> -> vector<8x128xf32>
      %51 = arith.addf %48, %50 : vector<8x128xf32>
      %52 = math.tanh %51 : vector<8x128xf32>
      %c3_i32 = arith.constant 3 : i32
      %53 = vector.broadcast %c3_i32 : i32 to vector<8x1xi32>
      %54 = arith.cmpi sgt, %13, %53 : vector<8x1xi32>
      %55 = vector.shape_cast %54 : vector<8x1xi1> to vector<8x1xi1>
      %56 = vector.broadcast %55 : vector<8x1xi1> to vector<8x128xi1>
      %57 = arith.select %56, %52, %46 : vector<8x128xi1>, vector<8x128xf32>
      %c4 = arith.constant 4 : index
      %c0_20 = arith.constant 0 : index
      %c0_21 = arith.constant 0 : index
      %58 = vector.load %arg4[%c4, %c0_20, %c0_21] : memref<8x8x128xf32, #tpu.memory_space<vmem>>, vector<1x8x128xf32>
      %59 = vector.shape_cast %58 : vector<1x8x128xf32> to vector<8x128xf32>
      %60 = arith.truncf %57 : vector<8x128xf32> to vector<8x128xbf16>
      %cst_22 = arith.constant dense<0.000000e+00> : vector<8x128xf32>
      %61 = tpu.matmul %60, %9, %cst_22 {dimension_numbers = #tpu.dot_dimension_numbers<[1], [0], [0], [1], [0, 0, 1, 1], [], []>} : vector<8x128xbf16>, vector<128x128xbf16>, vector<8x128xf32> -> vector<8x128xf32>
      %62 = arith.addf %59, %61 : vector<8x128xf32>
      %63 = math.tanh %62 : vector<8x128xf32>
      %c4_i32 = arith.constant 4 : i32
      %64 = vector.broadcast %c4_i32 : i32 to vector<8x1xi32>
      %65 = arith.cmpi sgt, %13, %64 : vector<8x1xi32>
      %66 = vector.shape_cast %65 : vector<8x1xi1> to vector<8x1xi1>
      %67 = vector.broadcast %66 : vector<8x1xi1> to vector<8x128xi1>
      %68 = arith.select %67, %63, %57 : vector<8x128xi1>, vector<8x128xf32>
      %c5 = arith.constant 5 : index
      %c0_23 = arith.constant 0 : index
      %c0_24 = arith.constant 0 : index
      %69 = vector.load %arg4[%c5, %c0_23, %c0_24] : memref<8x8x128xf32, #tpu.memory_space<vmem>>, vector<1x8x128xf32>
      %70 = vector.shape_cast %69 : vector<1x8x128xf32> to vector<8x128xf32>
      %71 = arith.truncf %68 : vector<8x128xf32> to vector<8x128xbf16>
      %cst_25 = arith.constant dense<0.000000e+00> : vector<8x128xf32>
      %72 = tpu.matmul %71, %9, %cst_25 {dimension_numbers = #tpu.dot_dimension_numbers<[1], [0], [0], [1], [0, 0, 1, 1], [], []>} : vector<8x128xbf16>, vector<128x128xbf16>, vector<8x128xf32> -> vector<8x128xf32>
      %73 = arith.addf %70, %72 : vector<8x128xf32>
      %74 = math.tanh %73 : vector<8x128xf32>
      %c5_i32 = arith.constant 5 : i32
      %75 = vector.broadcast %c5_i32 : i32 to vector<8x1xi32>
      %76 = arith.cmpi sgt, %13, %75 : vector<8x1xi32>
      %77 = vector.shape_cast %76 : vector<8x1xi1> to vector<8x1xi1>
      %78 = vector.broadcast %77 : vector<8x1xi1> to vector<8x128xi1>
      %79 = arith.select %78, %74, %68 : vector<8x128xi1>, vector<8x128xf32>
      %c6 = arith.constant 6 : index
      %c0_26 = arith.constant 0 : index
      %c0_27 = arith.constant 0 : index
      %80 = vector.load %arg4[%c6, %c0_26, %c0_27] : memref<8x8x128xf32, #tpu.memory_space<vmem>>, vector<1x8x128xf32>
      %81 = vector.shape_cast %80 : vector<1x8x128xf32> to vector<8x128xf32>
      %82 = arith.truncf %79 : vector<8x128xf32> to vector<8x128xbf16>
      %cst_28 = arith.constant dense<0.000000e+00> : vector<8x128xf32>
      %83 = tpu.matmul %82, %9, %cst_28 {dimension_numbers = #tpu.dot_dimension_numbers<[1], [0], [0], [1], [0, 0, 1, 1], [], []>} : vector<8x128xbf16>, vector<128x128xbf16>, vector<8x128xf32> -> vector<8x128xf32>
      %84 = arith.addf %81, %83 : vector<8x128xf32>
      %85 = math.tanh %84 : vector<8x128xf32>
      %c6_i32 = arith.constant 6 : i32
      %86 = vector.broadcast %c6_i32 : i32 to vector<8x1xi32>
      %87 = arith.cmpi sgt, %13, %86 : vector<8x1xi32>
      %88 = vector.shape_cast %87 : vector<8x1xi1> to vector<8x1xi1>
      %89 = vector.broadcast %88 : vector<8x1xi1> to vector<8x128xi1>
      %90 = arith.select %89, %85, %79 : vector<8x128xi1>, vector<8x128xf32>
      %c7 = arith.constant 7 : index
      %c0_29 = arith.constant 0 : index
      %c0_30 = arith.constant 0 : index
      %91 = vector.load %arg4[%c7, %c0_29, %c0_30] : memref<8x8x128xf32, #tpu.memory_space<vmem>>, vector<1x8x128xf32>
      %92 = vector.shape_cast %91 : vector<1x8x128xf32> to vector<8x128xf32>
      %93 = arith.truncf %90 : vector<8x128xf32> to vector<8x128xbf16>
      %cst_31 = arith.constant dense<0.000000e+00> : vector<8x128xf32>
      %94 = tpu.matmul %93, %9, %cst_31 {dimension_numbers = #tpu.dot_dimension_numbers<[1], [0], [0], [1], [0, 0, 1, 1], [], []>} : vector<8x128xbf16>, vector<128x128xbf16>, vector<8x128xf32> -> vector<8x128xf32>
      %95 = arith.addf %92, %94 : vector<8x128xf32>
      %96 = math.tanh %95 : vector<8x128xf32>
      %c7_i32 = arith.constant 7 : i32
      %97 = vector.broadcast %c7_i32 : i32 to vector<8x1xi32>
      %98 = arith.cmpi sgt, %13, %97 : vector<8x1xi32>
      %99 = vector.shape_cast %98 : vector<8x1xi1> to vector<8x1xi1>
      %100 = vector.broadcast %99 : vector<8x1xi1> to vector<8x128xi1>
      %101 = arith.select %100, %96, %90 : vector<8x128xi1>, vector<8x128xf32>
      %c0_32 = arith.constant 0 : index
      %c0_33 = arith.constant 0 : index
      %102 = vector.load %arg7[%c0_32, %c0_33] : memref<8x128xf32, #tpu.memory_space<vmem>>, vector<8x128xf32>
      tpu.vector_store %arg7[%c0_32, %c0_33], %101 {strides = array<i32>} : memref<8x128xf32, #tpu.memory_space<vmem>>, vector<8x128xf32>,
    } else {
    }
    return
  }
  func.func @transform_0(%arg0: i32, %arg1: i32, %arg2: memref<1xi32, #tpu.memory_space<smem>>) -> (i32, i32) {
    %c0_i32 = arith.constant 0 : i32
    %c0_i32_0 = arith.constant 0 : i32
    return %arg0, %c0_i32 : i32, i32
  }
  func.func @transform_1(%arg0: i32, %arg1: i32, %arg2: memref<1xi32, #tpu.memory_space<smem>>) -> (i32, i32, i32) {
    %0 = arith.index_cast %arg0 : i32 to index
    %1 = memref.load %arg2[%0] : memref<1xi32, #tpu.memory_space<smem>>
    %c1_i32 = arith.constant 1 : i32
    %2 = arith.subi %1, %c1_i32 : i32
    %3 = arith.minsi %arg1, %2 : i32
    %c0_i32 = arith.constant 0 : i32
    %4 = arith.maxsi %3, %c0_i32 : i32
    %c0_i32_0 = arith.constant 0 : i32
    %c0_i32_1 = arith.constant 0 : i32
    return %4, %arg0, %c0_i32_0 : i32, i32, i32
  }
  func.func @transform_2(%arg0: i32, %arg1: i32, %arg2: memref<1xi32, #tpu.memory_space<smem>>) -> (i32, i32) {
    %c0_i32 = arith.constant 0 : i32
    %c0_i32_0 = arith.constant 0 : i32
    %c0_i32_1 = arith.constant 0 : i32
    return %c0_i32, %c0_i32_0 : i32, i32
  }
  func.func @transform_3(%arg0: i32, %arg1: i32, %arg2: memref<1xi32, #tpu.memory_space<smem>>) -> (i32, i32) {
    %c0_i32 = arith.constant 0 : i32
    %c0_i32_0 = arith.constant 0 : i32
    return %arg0, %c0_i32 : i32, i32
  }
  func.func @transform_4(%arg0: i32, %arg1: i32, %arg2: memref<1xi32, #tpu.memory_space<smem>>) -> (i32, i32) {
    %c0_i32 = arith.constant 0 : i32
    %c0_i32_0 = arith.constant 0 : i32
    return %arg0, %c0_i32 : i32, i32
  }
}

</mosaic_0001>

<bundles_post_ra>
// kernel: program_encoder_forward.1
= control target key start
LH: loop header
LB: loop body
LE: loop exit
PB: predicated region body
PF: predicated region fallthrough
CT: control target
= control target key end

     0   :  { %s1139_s0 = inlined_call_operand.<no memory space> [shape: s32[1], index: 0, kind: input, shape index: {}]   ;;  %s1140_s1 = inlined_call_operand.vmem [shape: s32[8,1], index: 1, kind: input, shape index: {}]   ;;  %s1141_s2 = inlined_call_operand.vmem [shape: f32[8,8,128], index: 2, kind: input, shape index: {}]   ;;  %s1142_s3 = inlined_call_operand.vmem [shape: bf16[128,128], index: 3, kind: input, shape index: {}]   ;;  %s1143_s4 = inlined_call_operand.vmem [shape: f32[8,128], index: 4, kind: input, shape index: {}]   ;;  %s1144_s5 = inlined_call_operand.vmem [shape: f32[8,128], index: 5, kind: output, shape index: {}]  }
   0x1   :  { %v71_v0 = vld [vmem:[%s1143_s4] sm:$0xff]  ;;  %p583_p0 = scmp.le.s32.totalorder %s1139_s0, 0 }
   0x2   :  { %72 = vst [vmem:[%s1144_s5] sm:$0xff] %v71_v0  ;;  %v905_v1 = vld [vmem:[%s1142_s3] sm:$0xff] (!%p583_p0)   ;;  %v860_v2 = vmov (!%p583_p0), 0.0   ;;  %v913_v3 = vld [vmem:[%s1142_s3 + $0x8] sm:$0xff] (!%p583_p0)   ;;  %vm861_vm0 = vmmov (!%p583_p0), 0   ;;  %v862_v4 = vmov (!%p583_p0), 0   ;;  %v928_v5 = vld [vmem:[%s1142_s3 + $0x10] sm:$0xff] (!%p583_p0)  }
   0x3   :  { %77 = sbr.rel (%p583_p0) target bundleno = 1858 (0x742), region = 25  ;;  %671 = vmatprep.subr.bf16.mxu0 (!%p583_p0), %v860_v2  ;;  %691 = vmatprep.subr.bf16.mxu1 (!%p583_p0), %v860_v2  ;;  %v934_v6 = vld [vmem:[%s1140_s1] sm:$0xff] (!%p583_p0)  ;;  %v944_v7 = vld [vmem:[%s1142_s3 + $0x18] sm:$0xff] (!%p583_p0)   ;;  %v967_v12 = vld [vmem:[%s1142_s3 + $0x28] sm:$0xff] (!%p583_p0)  }
   0x4   :  { %672 = vmatpush3.bf16.msra.mxu0 (!%p583_p0), %v905_v1  ;;  %687 = vmatprep.mubr.msk.bf16.mxu0 (!%p583_p0), %vm861_vm0, %v860_v2  ;;  %vm191_vm1 = vcmp.gt.s32.totalorder (!%p583_p0), %v934_v6, 0  ;;  %vm243_vm2 = vcmp.gt.s32.totalorder (!%p583_p0), %v934_v6, 1  ;;  %vm399_vm3 = vcmp.gt.s32.totalorder (!%p583_p0), %v934_v6, 4  ;;  %v956_v10 = vld [vmem:[%s1142_s3 + $0x20] sm:$0xff] (!%p583_p0)   ;;  %vm503_vm4 = vcmp.gt.s32.totalorder (!%p583_p0), %v934_v6, 6  ;;  %v977_v14 = vld [vmem:[%s1142_s3 + $0x30] sm:$0xff] (!%p583_p0)  }
   0x5   :  { %673 = vmatprep.subr.bf16.mxu0 (!%p583_p0), %v860_v2  ;;  %834 = vset.pattern.permute.xlu0 (!%p583_p0), %v862_v4  ;;  %v192_v8 = vsel (!%p583_p0), %vm191_vm1, 1, %v862_v4  ;;  %v244_v9 = vsel (!%p583_p0), %vm243_vm2, 1, %v862_v4  ;;  %v400_v11 = vsel (!%p583_p0), %vm399_vm3, 1, %v862_v4  ;;  %v504_v13 = vsel (!%p583_p0), %vm503_vm4, 1, %v862_v4  ;;  %v986_v15 = vld [vmem:[%s1142_s3 + $0x38] sm:$0xff] (!%p583_p0)   ;;  %v99_v18 = vld [vmem:[%s1141_s2] sm:$0xff] (!%p583_p0) }
   0x6   :  { %692 = vmatpush3.bf16.msra.mxu1 (!%p583_p0), %v905_v1  ;;  %707 = vmatprep.mubr.msk.bf16.mxu1 (!%p583_p0), %vm861_vm0, %v860_v2  ;;  %vm295_vm6 = vcmp.gt.s32.totalorder (!%p583_p0), %v934_v6, 2  ;;  %vm347_vm7 = vcmp.gt.s32.totalorder (!%p583_p0), %v934_v6, 3  ;;  %vm451_vm8 = vcmp.gt.s32.totalorder (!%p583_p0), %v934_v6, 5  ;;  %vm555_vm9 = vcmp.gt.s32.totalorder (!%p583_p0), %v934_v6, 7  ;;  %v592_v32 = vld [vmem:[%s1141_s2 + $0x8] sm:$0xff] (!%p583_p0)  ;;  %v593_v42 = vld [vmem:[%s1141_s2 + $0x10] sm:$0xff] (!%p583_p0) }
   0x7   :  { %693 = vmatprep.subr.bf16.mxu1 (!%p583_p0), %v860_v2  ;;  %835 = vset.pattern.permute.xlu1 (!%p583_p0), %v862_v4  ;;  %v296_v28 = vsel (!%p583_p0), %vm295_vm6, 1, %v862_v4  ;;  %v348_v29 = vsel (!%p583_p0), %vm347_vm7, 1, %v862_v4  ;;  %v452_v30 = vsel (!%p583_p0), %vm451_vm8, 1, %v862_v4  ;;  %v556_v31 = vsel (!%p583_p0), %vm555_vm9, 1, %v862_v4  ;;  %v594_v52 = vld [vmem:[%s1141_s2 + $0x18] sm:$0xff] (!%p583_p0)  ;;  %v595_v62 = vld [vmem:[%s1141_s2 + $0x20] sm:$0xff] (!%p583_p0) }
   0x8   :  { %674 = vmatpush3.bf16.msra.mxu0 (!%p583_p0), %v913_v3  ;;  %194 = vperm.xlu0 (!%p583_p0), %834, %v192_v8  }
   0x9   :  { %675 = vmatprep.subr.bf16.mxu0 (!%p583_p0), %v860_v2  ;;  %v78_v16 = vld [vmem:[%s1144_s5] sm:$0xff] (!%p583_p0)  ;;  %298 = vperm.xlu1 (!%p583_p0), %835, %v296_v28   ;;  %v598_v28 = vld [vmem:[%s1141_s2 + $0x38] sm:$0xff] (!%p583_p0) }
   0xa   :  { %694 = vmatpush3.bf16.msra.mxu1 %v913_v3  ;;  %v100_v17 = vpack.c.bf16 %v78_v16, %v78_v16 }
   0xb   :  { %695 = vmatprep.subr.bf16.mxu1 %v860_v2 }
   0xc   :  { %676 = vmatpush3.bf16.msra.mxu0 %v928_v5  ;;  %246 = vperm.xlu0 %834, %v244_v9  }
   0xd   :  { %677 = vmatprep.subr.bf16.mxu0 %v860_v2  ;;  %350 = vperm.xlu1 %835, %v348_v29  }
   0xe   :  { %696 = vmatpush3.bf16.msra.mxu1 %v928_v5 }
   0xf   :  { %697 = vmatprep.subr.bf16.mxu1 %v860_v2 }
  0x10   :  { %678 = vmatpush3.bf16.msra.mxu0 %v944_v7  ;;  %402 = vperm.xlu0 %834, %v400_v11  }
  0x11   :  { %679 = vmatprep.subr.bf16.mxu0 %v860_v2  ;;  %454 = vperm.xlu1 %835, %v452_v30  }
  0x12   :  { %698 = vmatpush3.bf16.msra.mxu1 %v944_v7 }
  0x13   :  { %699 = vmatprep.subr.bf16.mxu1 %v860_v2 }
  0x14   :  { %680 = vmatpush3.bf16.msra.mxu0 %v956_v10  ;;  %506 = vperm.xlu0 %834, %v504_v13  }
  0x15   :  { %681 = vmatprep.subr.bf16.mxu0 %v860_v2  ;;  %558 = vperm.xlu1 %835, %v556_v31  }
  0x16   :  { %700 = vmatpush3.bf16.msra.mxu1 %v956_v10 }
  0x17   :  { %701 = vmatprep.subr.bf16.mxu1 %v860_v2 }
  0x18   :  { %682 = vmatpush3.bf16.msra.mxu0 %v967_v12 }
  0x19   :  { %683 = vmatprep.subr.bf16.mxu0 %v860_v2 }
  0x1a   :  { %702 = vmatpush3.bf16.msra.mxu1 %v967_v12 }
  0x1b   :  { %703 = vmatprep.subr.bf16.mxu1 %v860_v2 }
  0x1c   :  { %684 = vmatpush3.bf16.msra.mxu0 %v977_v14 }
  0x1d   :  { %685 = vmatprep.subr.bf16.mxu0 %v860_v2 }
  0x1e   :  { %704 = vmatpush3.bf16.msra.mxu1 %v977_v14 }
  0x1f   :  { %705 = vmatprep.subr.bf16.mxu1 %v860_v2 }
  0x20   :  { %686 = vmatpush3.bf16.msra.mxu0 %v986_v15 }
  0x21   :  { %711 = vmatprep.subr.bf16.mxu0 %v860_v2 }
  0x22   :  { %706 = vmatpush3.bf16.msra.mxu1 %v986_v15 }
  0x23   :  { %688 = vmatmul.mubr.bf16.vlgmr.msra.gmra.mrb[0].mxu0 %v100_v17  ;;  %731 = vmatprep.subr.bf16.mxu1 %v860_v2 }
  0x24   :  { %712 = vmatpush3.bf16.msra.mxu0 %v905_v1  ;;  %727 = vmatprep.mubr.msk.bf16.mxu0 %vm861_vm0, %v860_v2 }
  0x25   :  { %713 = vmatprep.subr.bf16.mxu0 %v860_v2 }
  0x28   :  { %714 = vmatpush3.bf16.msra.mxu0 %v913_v3 }
  0x29   :  { %715 = vmatprep.subr.bf16.mxu0 %v860_v2 }
  0x2c   :  { %716 = vmatpush3.bf16.msra.mxu0 %v928_v5 }
  0x2d   :  { %717 = vmatprep.subr.bf16.mxu0 %v860_v2 }
  0x30   :  { %718 = vmatpush3.bf16.msra.mxu0 %v944_v7 }
  0x31   :  { %719 = vmatprep.subr.bf16.mxu0 %v860_v2 }
  0x34   :  { %720 = vmatpush3.bf16.msra.mxu0 %v956_v10 }
  0x35   :  { %721 = vmatprep.subr.bf16.mxu0 %v860_v2 }
  0x38   :  { %722 = vmatpush3.bf16.msra.mxu0 %v967_v12 }
  0x39   :  { %723 = vmatprep.subr.bf16.mxu0 %v860_v2 }
  0x3c   :  { %724 = vmatpush3.bf16.msra.mxu0 %v977_v14 }
  0x3d   :  { %725 = vmatprep.subr.bf16.mxu0 %v860_v2 }
  0x40   :  { %726 = vmatpush3.bf16.msra.mxu0 %v986_v15 }
  0x41   :  { %751 = vmatprep.subr.bf16.mxu0 %v860_v2 }
  0x87   :  { %v195_v24 = vpop.permute.xlu0 %194 }
  0x88   :  { %vm196_vm5 = vcmp.eq.s32.totalorder %v195_v24, 1  ;;  %v299_v48 = vpop.permute.xlu1 %298 }
  0x89   :  { %vm300_vm11 = vcmp.eq.s32.totalorder %v299_v48, 1 }
  0x8b   :  { %v247_v38 = vpop.permute.xlu0 %246 }
  0x8c   :  { %vm248_vm10 = vcmp.eq.s32.totalorder %v247_v38, 1  ;;  %v351_v58 = vpop.permute.xlu1 %350 }
  0x8d   :  { %vm352_vm12 = vcmp.eq.s32.totalorder %v351_v58, 1 }
  0x8f   :  { %v403_v9 = vpop.permute.xlu0 %402 }
  0x90   :  { %vm404_vm13 = vcmp.eq.s32.totalorder %v403_v9, 1 }
  0x93   :  { %v507_v24 = vpop.permute.xlu0 %506 }
  0x94   :  { %vm508_vm15 = vcmp.eq.s32.totalorder %v507_v24, 1 }
  0xf6   :  { %v183_v19 = vpop.f32.mrb[0].mxu0 }
  0xf7   :  { %v189_v20 = vadd.f32 %v183_v19, %v99_v18  ;;  %v689_v21 = vpop.f32.mrb[1].mxu0  ;;  %v455_v18 = vpop.permute.xlu1 %454 }
  0xf8   :  { %v186_v22 = vpop.f32.mrb[2].mxu0  ;;  %vm456_vm14 = vcmp.eq.s32.totalorder %v455_v18, 1 }
  0xf9   :  { %844 = vtanh.f32 %v189_v20  ;;  %v690_v23 = vpop.f32.mrb[3].mxu0 }
 0x103   :  { %v845_v25 = vpop.eup %844 }
 0x104   :  { %v197_v26 = vsel %vm196_vm5, %v845_v25, %v78_v16 }
 0x105   :  { %v200_v27 = vpack.c.bf16 %v197_v26, %v197_v26 }
 0x107   :  { %708 = vmatmul.mubr.bf16.vlgmr.msra.gmra.mrb[0].mxu1 %v200_v27 }
 0x108   :  { %732 = vmatpush3.bf16.msra.mxu1 %v905_v1  ;;  %747 = vmatprep.mubr.msk.bf16.mxu1 %vm861_vm0, %v860_v2 }
 0x109   :  { %733 = vmatprep.subr.bf16.mxu1 %v860_v2 }
 0x10c   :  { %734 = vmatpush3.bf16.msra.mxu1 %v913_v3 }
 0x10d   :  { %735 = vmatprep.subr.bf16.mxu1 %v860_v2 }
 0x110   :  { %736 = vmatpush3.bf16.msra.mxu1 %v928_v5 }
 0x111   :  { %737 = vmatprep.subr.bf16.mxu1 %v860_v2 }
 0x114   :  { %738 = vmatpush3.bf16.msra.mxu1 %v944_v7 }
 0x115   :  { %739 = vmatprep.subr.bf16.mxu1 %v860_v2 }
 0x118   :  { %740 = vmatpush3.bf16.msra.mxu1 %v956_v10 }
 0x119   :  { %741 = vmatprep.subr.bf16.mxu1 %v860_v2 }
 0x11c   :  { %742 = vmatpush3.bf16.msra.mxu1 %v967_v12 }
 0x11d   :  { %743 = vmatprep.subr.bf16.mxu1 %v860_v2 }
 0x120   :  { %744 = vmatpush3.bf16.msra.mxu1 %v977_v14 }
 0x121   :  { %745 = vmatprep.subr.bf16.mxu1 %v860_v2 }
 0x124   :  { %746 = vmatpush3.bf16.msra.mxu1 %v986_v15 }
 0x125   :  { %771 = vmatprep.subr.bf16.mxu1 %v860_v2 }
 0x1da   :  { %v235_v33 = vpop.f32.mrb[0].mxu1 }
 0x1db   :  { %v241_v34 = vadd.f32 %v592_v32, %v235_v33  ;;  %v709_v35 = vpop.f32.mrb[1].mxu1 }
 0x1dc   :  { %v238_v36 = vpop.f32.mrb[2].mxu1 }
 0x1dd   :  { %846 = vtanh.f32 %v241_v34  ;;  %v710_v37 = vpop.f32.mrb[3].mxu1  ;;  %v559_v34 = vpop.permute.xlu1 %558 }
 0x1e7   :  { %v847_v39 = vpop.eup %846 }
 0x1e8   :  { %v249_v40 = vsel %vm248_vm10, %v847_v39, %v197_v26 }
 0x1e9   :  { %v252_v41 = vpack.c.bf16 %v249_v40, %v249_v40 }
 0x1eb   :  { %728 = vmatmul.mubr.bf16.vlgmr.msra.gmra.mrb[4].mxu0 %v252_v41 }
 0x1ec   :  { %752 = vmatpush3.bf16.msra.mxu0 %v905_v1  ;;  %767 = vmatprep.mubr.msk.bf16.mxu0 %vm861_vm0, %v860_v2 }
 0x1ed   :  { %753 = vmatprep.subr.bf16.mxu0 %v860_v2 }
 0x1f0   :  { %754 = vmatpush3.bf16.msra.mxu0 %v913_v3 }
 0x1f1   :  { %755 = vmatprep.subr.bf16.mxu0 %v860_v2 }
 0x1f4   :  { %756 = vmatpush3.bf16.msra.mxu0 %v928_v5 }
 0x1f5   :  { %757 = vmatprep.subr.bf16.mxu0 %v860_v2 }
 0x1f8   :  { %758 = vmatpush3.bf16.msra.mxu0 %v944_v7 }
 0x1f9   :  { %759 = vmatprep.subr.bf16.mxu0 %v860_v2 }
 0x1fc   :  { %760 = vmatpush3.bf16.msra.mxu0 %v956_v10 }
 0x1fd   :  { %761 = vmatprep.subr.bf16.mxu0 %v860_v2 }
 0x200   :  { %762 = vmatpush3.bf16.msra.mxu0 %v967_v12 }
 0x201   :  { %763 = vmatprep.subr.bf16.mxu0 %v860_v2 }
 0x204   :  { %764 = vmatpush3.bf16.msra.mxu0 %v977_v14 }
 0x205   :  { %765 = vmatprep.subr.bf16.mxu0 %v860_v2 }
 0x208   :  { %766 = vmatpush3.bf16.msra.mxu0 %v986_v15 }
 0x209   :  { %791 = vmatprep.subr.bf16.mxu0 %v860_v2 }
 0x2be   :  { %v287_v43 = vpop.f32.mrb[4].mxu0 }
 0x2bf   :  { %v293_v44 = vadd.f32 %v593_v42, %v287_v43  ;;  %v729_v45 = vpop.f32.mrb[5].mxu0 }
 0x2c0   :  { %v290_v46 = vpop.f32.mrb[6].mxu0 }
 0x2c1   :  { %848 = vtanh.f32 %v293_v44  ;;  %v730_v47 = vpop.f32.mrb[7].mxu0 }
 0x2cb   :  { %v849_v49 = vpop.eup %848 }
 0x2cc   :  { %v301_v50 = vsel %vm300_vm11, %v849_v49, %v249_v40 }
 0x2cd   :  { %v304_v51 = vpack.c.bf16 %v301_v50, %v301_v50 }
 0x2cf   :  { %748 = vmatmul.mubr.bf16.vlgmr.msra.gmra.mrb[4].mxu1 %v304_v51 }
 0x2d0   :  { %772 = vmatpush3.bf16.msra.mxu1 %v905_v1  ;;  %787 = vmatprep.mubr.msk.bf16.mxu1 %vm861_vm0, %v860_v2 }
 0x2d1   :  { %773 = vmatprep.subr.bf16.mxu1 %v860_v2 }
 0x2d4   :  { %774 = vmatpush3.bf16.msra.mxu1 %v913_v3 }
 0x2d5   :  { %775 = vmatprep.subr.bf16.mxu1 %v860_v2 }
 0x2d8   :  { %776 = vmatpush3.bf16.msra.mxu1 %v928_v5 }
 0x2d9   :  { %777 = vmatprep.subr.bf16.mxu1 %v860_v2 }
 0x2dc   :  { %778 = vmatpush3.bf16.msra.mxu1 %v944_v7 }
 0x2dd   :  { %779 = vmatprep.subr.bf16.mxu1 %v860_v2 }
 0x2e0   :  { %780 = vmatpush3.bf16.msra.mxu1 %v956_v10 }
 0x2e1   :  { %781 = vmatprep.subr.bf16.mxu1 %v860_v2 }
 0x2e4   :  { %782 = vmatpush3.bf16.msra.mxu1 %v967_v12 }
 0x2e5   :  { %783 = vmatprep.subr.bf16.mxu1 %v860_v2 }
 0x2e8   :  { %784 = vmatpush3.bf16.msra.mxu1 %v977_v14 }
 0x2e9   :  { %785 = vmatprep.subr.bf16.mxu1 %v860_v2 }
 0x2ec   :  { %786 = vmatpush3.bf16.msra.mxu1 %v986_v15 }
 0x2ed   :  { %811 = vmatprep.subr.bf16.mxu1 %v860_v2 }
 0x3a2   :  { %v339_v53 = vpop.f32.mrb[4].mxu1 }
 0x3a3   :  { %v345_v54 = vadd.f32 %v594_v52, %v339_v53  ;;  %v749_v55 = vpop.f32.mrb[5].mxu1 }
 0x3a4   :  { %v342_v56 = vpop.f32.mrb[6].mxu1 }
 0x3a5   :  { %850 = vtanh.f32 %v345_v54  ;;  %v750_v57 = vpop.f32.mrb[7].mxu1 }
 0x3af   :  { %v851_v59 = vpop.eup %850 }
 0x3b0   :  { %v353_v60 = vsel %vm352_vm12, %v851_v59, %v301_v50 }
 0x3b1   :  { %v356_v61 = vpack.c.bf16 %v353_v60, %v353_v60 }
 0x3b3   :  { %768 = vmatmul.mubr.bf16.vlgmr.msra.gmra.mrb[8].mxu0 %v356_v61 }
 0x3b4   :  { %792 = vmatpush3.bf16.msra.mxu0 %v905_v1  ;;  %807 = vmatprep.mubr.msk.bf16.mxu0 %vm861_vm0, %v860_v2 }
 0x3b5   :  { %793 = vmatprep.subr.bf16.mxu0 %v860_v2 }
 0x3b8   :  { %794 = vmatpush3.bf16.msra.mxu0 %v913_v3 }
 0x3b9   :  { %795 = vmatprep.subr.bf16.mxu0 %v860_v2 }
 0x3bc   :  { %796 = vmatpush3.bf16.msra.mxu0 %v928_v5 }
 0x3bd   :  { %797 = vmatprep.subr.bf16.mxu0 %v860_v2 }
 0x3c0   :  { %798 = vmatpush3.bf16.msra.mxu0 %v944_v7 }
 0x3c1   :  { %799 = vmatprep.subr.bf16.mxu0 %v860_v2 }
 0x3c4   :  { %800 = vmatpush3.bf16.msra.mxu0 %v956_v10 }
 0x3c5   :  { %801 = vmatprep.subr.bf16.mxu0 %v860_v2 }
 0x3c8   :  { %802 = vmatpush3.bf16.msra.mxu0 %v967_v12 }
 0x3c9   :  { %803 = vmatprep.subr.bf16.mxu0 %v860_v2 }
 0x3cc   :  { %804 = vmatpush3.bf16.msra.mxu0 %v977_v14 }
 0x3cd   :  { %805 = vmatprep.subr.bf16.mxu0 %v860_v2 }
 0x3d0   :  { %806 = vmatpush3.bf16.msra.mxu0 %v986_v15 }
 0x486   :  { %v391_v63 = vpop.f32.mrb[8].mxu0 }
 0x487   :  { %v397_v0 = vadd.f32 %v595_v62, %v391_v63  ;;  %v769_v4 = vpop.f32.mrb[9].mxu0 }
 0x488   :  { %v394_v6 = vpop.f32.mrb[10].mxu0 }
 0x489   :  { %852 = vtanh.f32 %v397_v0  ;;  %v770_v8 = vpop.f32.mrb[11].mxu0 }
 0x493   :  { %v853_v11 = vpop.eup %852 }
 0x494   :  { %v405_v13 = vsel %vm404_vm13, %v853_v11, %v353_v60 }
 0x495   :  { %v408_v16 = vpack.c.bf16 %v405_v13, %v405_v13 }
 0x497   :  { %788 = vmatmul.mubr.bf16.vlgmr.msra.gmra.mrb[8].mxu1 %v408_v16 }
 0x498   :  { %812 = vmatpush3.bf16.msra.mxu1 %v905_v1  ;;  %827 = vmatprep.mubr.msk.bf16.mxu1 %vm861_vm0, %v860_v2  ;;  %v596_v1 = vld [vmem:[%s1141_s2 + $0x28] sm:$0xff]  ;;  %vm560_vm0 = vcmp.eq.s32.totalorder %v559_v34, 1 }
 0x499   :  { %813 = vmatprep.subr.bf16.mxu1 %v860_v2 }
 0x49c   :  { %814 = vmatpush3.bf16.msra.mxu1 %v913_v3 }
 0x49d   :  { %815 = vmatprep.subr.bf16.mxu1 %v860_v2 }
 0x4a0   :  { %816 = vmatpush3.bf16.msra.mxu1 %v928_v5 }
 0x4a1   :  { %817 = vmatprep.subr.bf16.mxu1 %v860_v2 }
 0x4a4   :  { %818 = vmatpush3.bf16.msra.mxu1 %v944_v7 }
 0x4a5   :  { %819 = vmatprep.subr.bf16.mxu1 %v860_v2 }
 0x4a8   :  { %820 = vmatpush3.bf16.msra.mxu1 %v956_v10 }
 0x4a9   :  { %821 = vmatprep.subr.bf16.mxu1 %v860_v2 }
 0x4ac   :  { %822 = vmatpush3.bf16.msra.mxu1 %v967_v12 }
 0x4ad   :  { %823 = vmatprep.subr.bf16.mxu1 %v860_v2 }
 0x4b0   :  { %824 = vmatpush3.bf16.msra.mxu1 %v977_v14 }
 0x4b1   :  { %825 = vmatprep.subr.bf16.mxu1 %v860_v2  ;;  %v597_v2 = vld [vmem:[%s1141_s2 + $0x30] sm:$0xff] }
 0x4b4   :  { %826 = vmatpush3.bf16.msra.mxu1 %v986_v15 }
 0x56a   :  { %v443_v3 = vpop.f32.mrb[8].mxu1 }
 0x56b   :  { %v449_v5 = vadd.f32 %v596_v1, %v443_v3  ;;  %v789_v7 = vpop.f32.mrb[9].mxu1 }
 0x56c   :  { %v446_v10 = vpop.f32.mrb[10].mxu1 }
 0x56d   :  { %854 = vtanh.f32 %v449_v5  ;;  %v790_v17 = vpop.f32.mrb[11].mxu1 }
 0x577   :  { %v855_v12 = vpop.eup %854 }
 0x578   :  { %v457_v19 = vsel %vm456_vm14, %v855_v12, %v405_v13 }
 0x579   :  { %v460_v20 = vpack.c.bf16 %v457_v19, %v457_v19 }
 0x57b   :  { %808 = vmatmul.mubr.bf16.vlgmr.msra.gmra.mrb[12].mxu0 %v460_v20 }
 0x64e   :  { %v495_v14 = vpop.f32.mrb[12].mxu0 }
 0x64f   :  { %v501_v15 = vadd.f32 %v597_v2, %v495_v14  ;;  %v809_v21 = vpop.f32.mrb[13].mxu0 }
 0x650   :  { %v498_v22 = vpop.f32.mrb[14].mxu0 }
 0x651   :  { %856 = vtanh.f32 %v501_v15  ;;  %v810_v23 = vpop.f32.mrb[15].mxu0 }
 0x65b   :  { %v857_v25 = vpop.eup %856 }
 0x65c   :  { %v509_v26 = vsel %vm508_vm15, %v857_v25, %v457_v19 }
 0x65d   :  { %v512_v27 = vpack.c.bf16 %v509_v26, %v509_v26 }
 0x65f   :  { %828 = vmatmul.mubr.bf16.vlgmr.msra.gmra.mrb[12].mxu1 %v512_v27 }
 0x732   :  { %v547_v29 = vpop.f32.mrb[12].mxu1 }
 0x733   :  { %v553_v30 = vadd.f32 %v598_v28, %v547_v29  ;;  %v829_v31 = vpop.f32.mrb[13].mxu1 }
 0x734   :  { %v550_v32 = vpop.f32.mrb[14].mxu1 }
 0x735   :  { %858 = vtanh.f32 %v553_v30  ;;  %v830_v33 = vpop.f32.mrb[15].mxu1 }
 0x73f   :  { %v859_v35 = vpop.eup %858 }
 0x740   :  { %v561_v36 = vsel %vm560_vm0, %v859_v35, %v509_v26 }
 0x741   :  { %562 = vst [vmem:[%s1144_s5] sm:$0xff] %v561_v36 }
 0x742 PF:  {}

</bundles_post_ra>
